<compile_context>
chip_gen: v5e
topology: v5e:2x2
jax: 0.10.0
libtpu: 0.0.40
codegen_flags: <defaults>
</compile_context>

<pallas_src>
import functools

import jax
import jax.numpy as jnp
from jax.experimental import pallas as pl
from jax.experimental.pallas import tpu as pltpu

_EPS = 1e-12  # matches torch.nn.functional.normalize default eps


def _round_up(x, m):
    return ((x + m - 1) // m) * m


def _pad_rows(x, rows):
    n = x.shape[0]
    if rows == n:
        return x
    return jnp.pad(x, ((0, rows - n), (0, 0)))


# --------------------------- prologue: L2 normalize ---------------------------
def _normalize_kernel(x_ref, o_ref):
    x = x_ref[...].astype(jnp.float32)
    ss = jnp.sum(x * x, axis=-1, keepdims=True)
    # x * rsqrt(max(||x||^2, eps^2)) == x / max(||x||, eps)  (torch F.normalize)
    o_ref[...] = (x * jax.lax.rsqrt(jnp.maximum(ss, _EPS * _EPS))).astype(o_ref.dtype)


def _normalize_rows(x, out_dtype, tile):
    rows, d = x.shape
    return pl.pallas_call(
        _normalize_kernel,
        out_shape=jax.ShapeDtypeStruct((rows, d), out_dtype),
        grid=(rows // tile,),
        in_specs=[pl.BlockSpec((tile, d), lambda i: (i, 0))],
        out_specs=pl.BlockSpec((tile, d), lambda i: (i, 0)),
        compiler_params=pltpu.CompilerParams(dimension_semantics=("parallel",)),
    )(x)


# ----------------------------- main fused kernel ------------------------------
def _infonce_kernel(q_ref, p_ref, k_ref, o_ref, pos_sc, m_sc, l_sc, *,
                    inv_temperature, n_rows, n_cols, tq, tk,
                    pos_in_keys, mask_rows, mask_cols, loss_scale):
    row = pl.program_id(0)
    col = pl.program_id(1)
    last_col = pl.num_programs(1) - 1

    @pl.when(jnp.logical_and(row == 0, col == 0))
    def _init_out():
        o_ref[...] = jnp.zeros_like(o_ref)

    @pl.when(col == 0)
    def _init_row():
        # positive logit = sum(q * p, -1) / T  (== diagonal of q @ p^T for the
        # in-batch-negatives path; no iota/where diagonal extraction needed).
        qf = q_ref[...].astype(jnp.float32)
        pf = p_ref[...].astype(jnp.float32)
        pos_sc[...] = jnp.sum(qf * pf, axis=-1, keepdims=True) * inv_temperature
        if pos_in_keys:
            # positive logit already appears among the key logits -> empty LSE.
            m_sc[...] = jnp.full_like(m_sc, -jnp.inf)
            l_sc[...] = jnp.zeros_like(l_sc)
        else:
            # explicit negatives: seed the online LSE with the positive column.
            m_sc[...] = pos_sc[...]
            l_sc[...] = jnp.ones_like(l_sc)

    # Similarity tile on the MXU: contract last axes directly (no .T transpose).
    s = jax.lax.dot_general(
        q_ref[...], k_ref[...], (((1,), (1,)), ((), ())),
        preferred_element_type=jnp.float32) * inv_temperature          # (tq, tk)

    if mask_cols:
        cidx = col * tk + jax.lax.broadcasted_iota(jnp.int32, s.shape, 1)
        s = jnp.where(cidx < n_cols, s, -jnp.inf)

    # online log-sum-exp update over column tiles
    m_prev = m_sc[...]
    m_new = jnp.maximum(m_prev, jnp.max(s, axis=-1, keepdims=True))
    alpha = jnp.exp(m_prev - m_new)
    l_sc[...] = alpha * l_sc[...] + jnp.sum(jnp.exp(s - m_new), axis=-1, keepdims=True)
    m_sc[...] = m_new

    @pl.when(col == last_col)
    def _finalize_row():
        lse = m_sc[...] + jnp.log(l_sc[...])
        per_row = lse - pos_sc[...]                                    # (tq, 1)
        if mask_rows:
            ridx = row * tq + jax.lax.broadcasted_iota(jnp.int32, per_row.shape, 0)
            per_row = jnp.where(ridx < n_rows, per_row, 0.0)
        # output block index is (0,0) for the whole grid -> stays VMEM-resident
        # and is written back to HBM exactly once at the end of the grid.
        o_ref[...] += jnp.sum(per_row, keepdims=True) * loss_scale


# --------------------------------- wrapper ------------------------------------
def infonce_loss(query, positive_key, negative_keys=None,
                 temperature=0.1, reduction="mean", negative_mode="unpaired",
                 use_bf16_matmul=False):
    """JAX/Pallas equivalent of InfoNCE.forward (returns a scalar loss)."""
    if query.ndim != 2 or positive_key.ndim != 2:
        raise ValueError("<query> and <positive_key> must have 2 dimensions.")
    n, d = query.shape
    if positive_key.shape != (n, d):
        raise ValueError("<query> and <positive_key> shape mismatch.")
    if reduction not in ("mean", "sum"):
        # TODO(synk): reduction='none' (per-sample loss vector) not implemented.
        raise NotImplementedError("only reduction in ('mean','sum') is implemented")
    if negative_keys is not None and negative_mode != "unpaired":
        # TODO(synk): negative_mode='paired' (N, M, D) negatives not implemented.
        raise NotImplementedError("only negative_mode='unpaired' is implemented")

    # bf16 MXU operands (f32 accumulation) are a big win on v6e/v7x but change
    # the logits by ~1e-3 rel; keep f32 by default to match the f32 reference.
    compute_dtype = jnp.bfloat16 if use_bf16_matmul else jnp.float32

    if negative_keys is None:
        # in-batch negatives: keys = positive_key, labels = arange(N)
        n_cols = n
        pos_in_keys = True
        tq = min(256, _round_up(n, 8))
        tk = tq                       # single padded length for positive_key
        nr = _round_up(n, tq)
        nc = nr
        qn = _normalize_rows(_pad_rows(query, nr), compute_dtype, tq)
        pn = _normalize_rows(_pad_rows(positive_key, nr), compute_dtype, tq)
        keys = pn
    else:
        if negative_keys.ndim != 2 or negative_keys.shape[-1] != d:
            raise ValueError("<negative_keys> must be (M, D) with matching D.")
        n_cols = negative_keys.shape[0]
        pos_in_keys = False
        tq = min(256, _round_up(n, 8))
        tk = min(512, _round_up(n_cols, 8))
        nr = _round_up(n, tq)
        nc = _round_up(n_cols, tk)
        qn = _normalize_rows(_pad_rows(query, nr), compute_dtype, tq)
        pn = _normalize_rows(_pad_rows(positive_key, nr), compute_dtype, tq)
        keys = _normalize_rows(_pad_rows(negative_keys, nc), compute_dtype, tk)

    grid = (nr // tq, nc // tk)
    kernel = functools.partial(
        _infonce_kernel,
        inv_temperature=1.0 / float(temperature),
        n_rows=n, n_cols=n_cols, tq=tq, tk=tk,
        pos_in_keys=pos_in_keys,
        mask_rows=(nr != n), mask_cols=(nc != n_cols),
        loss_scale=(1.0 / n) if reduction == "mean" else 1.0,
    )

    itemsize = jnp.dtype(compute_dtype).itemsize
    bytes_in = (qn.size + pn.size + (0 if keys is pn else keys.size)) * itemsize
    cost = pl.CostEstimate(
        flops=2 * nr * nc * d + 6 * nr * nc,
        transcendentals=nr * nc + 2 * nr,
        bytes_accessed=int(bytes_in) + 4,
    )

    out = pl.pallas_call(
        kernel,
        out_shape=jax.ShapeDtypeStruct((1, 1), jnp.float32),
        grid=grid,
        in_specs=[
            pl.BlockSpec((tq, d), lambda i, j: (i, 0)),   # query row tile
            pl.BlockSpec((tq, d), lambda i, j: (i, 0)),   # positive row tile
            pl.BlockSpec((tk, d), lambda i, j: (j, 0)),   # key column tile
        ],
        out_specs=pl.BlockSpec((1, 1), lambda i, j: (0, 0)),
        scratch_shapes=[
            pltpu.VMEM((tq, 1), jnp.float32),   # positive logit per row
            pltpu.VMEM((tq, 1), jnp.float32),   # running max
            pltpu.VMEM((tq, 1), jnp.float32),   # running sum-exp
        ],
        # scalar loss is accumulated across row tiles into the resident output,
        # so both axes are "arbitrary" (no cross-core race on the accumulator).
        compiler_params=pltpu.CompilerParams(
            dimension_semantics=("arbitrary", "arbitrary")),
        cost_estimate=cost,
    )(qn, pn, keys)
    return out[0, 0]


# ---------------- pure-JAX reference (for correctness check) ----------------
def _ref_infonce(query, positive_key, negative_keys=None, temperature=0.1):
    def norm(x):
        return x / jnp.maximum(jnp.linalg.norm(x, axis=-1, keepdims=True), _EPS)
    q = norm(query.astype(jnp.float32))
    p = norm(positive_key.astype(jnp.float32))
    if negative_keys is None:
        logits = q @ p.T / temperature
        labels = jnp.arange(q.shape[0])
    else:
        nk = norm(negative_keys.astype(jnp.float32))
        pos = jnp.sum(q * p, axis=1, keepdims=True)
        neg = q @ nk.T
        logits = jnp.concatenate([pos, neg], axis=1) / temperature
        labels = jnp.zeros(q.shape[0], dtype=jnp.int32)
    logp = jax.nn.log_softmax(logits, axis=-1)
    return -jnp.mean(jnp.take_along_axis(logp, labels[:, None], axis=1))


if __name__ == "__main__":
    root = jax.random.PRNGKey(0)
    keys = jax.random.split(root, 6)

    def check(n, d, m, with_negs, k):
        k1, k2, k3 = jax.random.split(k, 3)
        q = jax.random.normal(k1, (n, d), dtype=jnp.float32)
        p = jax.random.normal(k2, (n, d), dtype=jnp.float32)
        nk = jax.random.normal(k3, (m, d), dtype=jnp.float32) if with_negs else None
        got = infonce_loss(q, p, nk, temperature=0.1)
        jax.block_until_ready(got)
        want = _ref_infonce(q, p, nk, temperature=0.1)
        assert jnp.allclose(got, want, atol=1e-4, rtol=1e-5), (
            (n, d, m, with_negs), got, want)

    # small, tile-aligned shapes (module example scale)
    check(8, 32, 16, False, keys[0])
    check(8, 32, 16, True, keys[1])
    # ragged shapes -> exercises row/column padding masks
    check(20, 32, 40, False, keys[2])
    check(20, 32, 40, True, keys[3])
    # multi-tile grids -> online LSE across column tiles and accumulation
    # of the scalar loss across row tiles
    check(300, 64, 0, False, keys[4])
    check(40, 64, 1100, True, keys[5])

    print("KERNEL_OK")
</pallas_src>

<mosaic_0001>
module attributes {stable_mosaic.version = 11 : i64} {
  func.func @_normalize_kernel(%arg0: i32, %arg1: memref<8x32xf32, #tpu.memory_space<vmem>>, %arg2: memref<8x32xf32, #tpu.memory_space<vmem>>) attributes {dimension_semantics = [#tpu.dimension_semantics<parallel>], iteration_bounds = array<i64: 1>, scalar_prefetch = 0 : i64, scratch_operands = 0 : i64, tpu.core_type = #tpu.core_type<tc>, window_params = [{transform_indices = @transform_0, window_bounds = array<i64: 8, 32>}, {transform_indices = @transform_1, window_bounds = array<i64: 8, 32>}]} {
    %c0 = arith.constant 0 : index
    %c0_0 = arith.constant 0 : index
    %0 = vector.load %arg1[%c0, %c0_0] : memref<8x32xf32, #tpu.memory_space<vmem>>, vector<8x32xf32>
    %1 = arith.mulf %0, %0 : vector<8x32xf32>
    %cst = arith.constant dense<0.000000e+00> : vector<8xf32>
    %2 = vector.multi_reduction <add>, %1, %cst [1] : vector<8x32xf32> to vector<8xf32>
    %3 = vector.shape_cast %2 : vector<8xf32> to vector<8x1xf32>
    %cst_1 = arith.constant 1.000000e-24 : f32
    %4 = vector.broadcast %cst_1 : f32 to vector<8x1xf32>
    %5 = arith.maximumf %3, %4 : vector<8x1xf32>
    %6 = math.rsqrt %5 : vector<8x1xf32>
    %7 = vector.broadcast %6 : vector<8x1xf32> to vector<8x32xf32>
    %8 = arith.mulf %0, %7 : vector<8x32xf32>
    %c0_2 = arith.constant 0 : index
    %c0_3 = arith.constant 0 : index
    %9 = vector.load %arg2[%c0_2, %c0_3] : memref<8x32xf32, #tpu.memory_space<vmem>>, vector<8x32xf32>
    tpu.vector_store %arg2[%c0_2, %c0_3], %8 {strides = array<i32>} : memref<8x32xf32, #tpu.memory_space<vmem>>, vector<8x32xf32>,
    return
  }
  func.func @transform_0(%arg0: i32) -> (i32, i32) {
    %c0_i32 = arith.constant 0 : i32
    %c0_i32_0 = arith.constant 0 : i32
    return %arg0, %c0_i32 : i32, i32
  }
  func.func @transform_1(%arg0: i32) -> (i32, i32) {
    %c0_i32 = arith.constant 0 : i32
    %c0_i32_0 = arith.constant 0 : i32
    return %arg0, %c0_i32 : i32, i32
  }
}

</mosaic_0001>

<bundles_post_ra>
// kernel: tpu_custom_call.1
= control target key start
LH: loop header
LB: loop body
LE: loop exit
PB: predicated region body
PF: predicated region fallthrough
CT: control target
= control target key end

     0   :  { %6 = vsyncpa [#allocation3], 0  ;;  %s135_s0 = inlined_call_operand.hbm [shape: f32[8,32], index: 0, kind: input, shape index: {}]   ;;  %s136_s1 = inlined_call_operand.hbm [shape: f32[8,32], index: 1, kind: output, shape index: {}]  }
   0x1   :  { %7 = vsyncpa [#allocation4], 0  ;;  %s13_s8 = sshll.u32 %s135_s0, 4  ;;  %s115_s9 = smov [#allocation2]   ;;  %s14_s8 = int_to_ptr.hbm [resolvable:$true] %s13_s8 }
   0x2   :  { %s15_s10 = sshll.u32 %s115_s9, 4  ;;  %s16_s10 = int_to_ptr.vmem [resolvable:$true] %s15_s10 }
   0x3   :  { %18 = dma.hbm_to_vmem [thread:$0]  %s14_s8, 128, %s16_s10, [#allocation3]  }
   0x4   :  { %111 = dma.done.wait [#allocation3], 128  }
   0x5   :  { %112 = vsyncadd [#allocation3], 4294967168  ;;  %v23_v0 = vld [vmem:[#allocation2] sm:$0xff]  ;;  %vm25_vm0 = vcmask 261120   ;;  %s116_s0 = smov [#allocation5]   ;;  %s49_s14 = sshll.u32 %s136_s1, 4  ;;  %s50_s14 = int_to_ptr.hbm [resolvable:$true] %s49_s14 }
   0x6   :  { %v24_v1 = vmul.f32 %v23_v0, %v23_v0  ;;  %s47_s11 = sshll.u32 %s116_s0, 4  ;;  %s48_s11 = int_to_ptr.vmem [resolvable:$true] %s47_s11 }
   0x8   :  { %v26_v2 = vsel %vm25_vm0, %v24_v1, 0.0 }
   0x9   :  { %27 = vadd.xlane.f32.xlu0 %v26_v2 }
  0x7c   :  { %v28_v3 = vpop.xlane.xlu0 %27 }
  0x7d   :  { %v29_v4 = vmax.f32 %v28_v3, 1e-24 }
  0x7f   :  { %61 = vrsqrt.f32 %v29_v4  ;;  %vm36_vm2 = vweird.f32 %v29_v4 }
  0x85   :  { %v62_v5 = vpop.eup %61 }
  0x86   :  { %v31_v6 = vmul.f32 %v62_v5, %v29_v4  ;;  %vm37_vm1 = vweird.f32 %v62_v5 }
  0x87   :  { %vm38_vm3 = vmor %vm36_vm2, %vm37_vm1 }
  0x88   :  { %v32_v7 = vmul.f32 %v62_v5, %v31_v6 }
  0x8a   :  { %v33_v8 = vmul.f32 0.5, %v32_v7 }
  0x8c   :  { %v34_v9 = vsub.f32 1.5, %v33_v8 }
  0x8e   :  { %v35_v10 = vmul.f32 %v62_v5, %v34_v9 }
  0x90   :  { %v39_v11 = vsel %vm38_vm3, %v62_v5, %v35_v10 }
  0x91   :  { %v40_v12 = vmul.f32 %v39_v11, %v23_v0 }
  0x93   :  { %41 = vst.msk [vmem:[#allocation5] sm:$0xff] %vm25_vm0, %v40_v12 }
  0x94   :  { %52 = dma.vmem_to_hbm [thread:$0]  %s48_s11, 128, %s50_s14, [#allocation4]  }
  0x95   :  { %113 = dma.done.wait [#allocation4], 128  }
  0x96   :  { %114 = vsyncadd [#allocation4], 4294967168 }
  0x97   :  { %57 = vsyncpa [#allocation3], 1 }
  0x98   :  { %58 = vsyncpa [#allocation4], 1 }

</bundles_post_ra>
